<compile_context>
chip_gen: v6e
topology: v6e:2x2x1
jax: 0.10.0
libtpu: 0.0.40
codegen_flags: <defaults>
</compile_context>

<pallas_src>
import functools

import jax
import jax.numpy as jnp
from jax.experimental import pallas as pl
from jax.experimental.pallas import tpu as pltpu


# ----------------------------- config (synthetic) -----------------------------
class Cfg:
    vit_hidden_dim = 32
    mp_pixel_shuffle_factor = 2
    lm_hidden_dim = 64


# --------------------------------- helpers ------------------------------------
def _round_up(v, m):
    return ((v + m - 1) // m) * m


def _pick_row_tile(m):
    """Smallest tail padding wins; ties go to the larger tile (fewer steps)."""
    best_t, best_pad = None, None
    for t in (256, 128, 64, 32, 16):  # multiples of 16: bf16 sublane packing
        pad = _round_up(m, t) - m
        if best_pad is None or pad < best_pad:
            best_t, best_pad = t, pad
    return best_t


def _largest_divisor_tile(extent, candidates):
    for t in candidates:
        if extent % t == 0:
            return t
    return extent


@functools.lru_cache(maxsize=None)
def _vmem_limit_bytes():
    # Generation-aware scoped-VMEM request: ~56 MiB on 128 MiB parts (v5e/v6e),
    # ~48 MiB on v7x (64 MiB physical).  Fall back to a safe 32 MiB.
    try:
        cap = int(pltpu.get_tpu_info().vmem_capacity_bytes)
        return int(min(56 * 1024 * 1024, (cap * 3) // 4))
    except Exception:
        return 32 * 1024 * 1024


# ------------------------------ pixel shuffle (glue) --------------------------
def pixel_shuffle(x, scale_factor):
    bsz, seq, embed_dim = x.shape
    seq_root = int(seq ** 0.5)
    assert seq_root ** 2 == seq
    assert seq_root % scale_factor == 0
    height = width = seq_root
    x = x.reshape(bsz, height, width, embed_dim)
    h_out = height // scale_factor
    w_out = width // scale_factor
    x = x.reshape(bsz, h_out, scale_factor, w_out, scale_factor, embed_dim)
    x = jnp.transpose(x, (0, 1, 3, 2, 4, 5))
    x = x.reshape(bsz, h_out * w_out, embed_dim * scale_factor ** 2)
    return x


# ------------------------------ Pallas matmul kernel ---------------------------
def _proj_kernel(x_ref, w_ref, o_ref, acc_ref):
    # x_ref: (tm, tk) bf16   w_ref: (tk, tn) bf16
    # o_ref: (tm, tn)        acc_ref: (tm, tn) f32, resident across the K axis.
    @pl.when(pl.program_id(2) == 0)
    def _():
        acc_ref[...] = jnp.zeros_like(acc_ref)

    acc_ref[...] += jnp.dot(
        x_ref[...], w_ref[...], preferred_element_type=jnp.float32
    )

    @pl.when(pl.program_id(2) == pl.num_programs(2) - 1)
    def _():
        o_ref[...] = acc_ref[...].astype(o_ref.dtype)


def proj_matmul(x2d, w_packed, *, out_dtype=jnp.float32):
    """x2d: (M, K) tokens; w_packed: (K_pad, N_pad) bf16, K_pad/N_pad % 128 == 0.

    Returns (M, N_pad) in out_dtype; the caller slices off the lane padding.
    """
    M, K = x2d.shape
    K_pad, N_pad = w_packed.shape
    assert K_pad % 128 == 0 and N_pad % 128 == 0 and K <= K_pad

    # bf16 operands (f32 accumulation inside the kernel).
    x2d = x2d.astype(jnp.bfloat16)
    if K != K_pad:
        x2d = jnp.pad(x2d, ((0, 0), (0, K_pad - K)))

    # ---- row (M) tiling ------------------------------------------------------
    tm = _pick_row_tile(M)
    M_pad = _round_up(M, tm)
    if M_pad // tm == 1 and tm >= 128:
        # Give the "parallel" M axis >= 2 steps so both v7x TensorCores get
        # work (one extra ~0.35us step on single-TC v5e/v6e: negligible).
        tm //= 2
    if M_pad != M:
        x2d = jnp.pad(x2d, ((0, M_pad - M), (0, 0)))

    # ---- N / K tiling --------------------------------------------------------
    # 256-wide N tiles fill the 2x256^2 MXU on v6e/v7x; 128 still native on v5e.
    tn = _largest_divisor_tile(N_pad, (256, 128))
    tk = _largest_divisor_tile(K_pad, (512, 384, 256, 128))

    grid = (M_pad // tm, N_pad // tn, K_pad // tk)

    # VMEM (double-buffered): 2*tm*tk*2 + 2*tk*tn*2 + 2*tm*tn*4 + tm*tn*4 bytes
    # <= ~1.9 MiB at tm=256, tk=512, tn=256 -- far under the scoped limit.
    # TODO(synk): single-buffer the weight block (pipeline_mode=pl.Buffered(1))
    # when grid[1] == grid[2] == 1 so a never-changing block is not
    # double-buffered; needs confirmation that Mosaic accepts buffer_count=1.
    out = pl.pallas_call(
        _proj_kernel,
        out_shape=jax.ShapeDtypeStruct((M_pad, N_pad), out_dtype),
        grid_spec=pltpu.PrefetchScalarGridSpec(
            num_scalar_prefetch=0,
            grid=grid,
            in_specs=[
                pl.BlockSpec((tm, tk), lambda i, j, k: (i, k)),
                pl.BlockSpec((tk, tn), lambda i, j, k: (k, j)),
            ],
            out_specs=pl.BlockSpec((tm, tn), lambda i, j, k: (i, j)),
            scratch_shapes=[pltpu.VMEM((tm, tn), jnp.float32)],
        ),
        compiler_params=pltpu.CompilerParams(
            dimension_semantics=("parallel", "parallel", "arbitrary"),
            vmem_limit_bytes=_vmem_limit_bytes(),
            # Let XLA fold the pixel-shuffle transpose / bf16 cast / pad chain
            # into the activation operand instead of a separate HBM round trip.
            allow_input_fusion=[True, False],
        ),
    )(x2d, w_packed)
    return out[:M]


# ------------------------------ fused forward ----------------------------------
@functools.partial(jax.jit, static_argnames=("scale_factor", "output_dim"))
def modality_projector_forward(x, w_packed, *, scale_factor, output_dim):
    x = pixel_shuffle(x, scale_factor)                 # (B, S_out, input_dim)
    B, S, K = x.shape
    out2d = proj_matmul(x.reshape(B * S, K), w_packed)  # (B*S_out, N_pad) f32
    # Lane padding sliced off inside the same jit (no-op when output_dim is
    # already a multiple of 128 at real LM sizes).
    # TODO(synk): emit bf16 from the kernel when the downstream LM accepts it.
    return out2d[:, :output_dim].reshape(B, S, output_dim)


# ------------------------------ module wrapper ---------------------------------
class ModalityProjector:
    def __init__(self, cfg, key):
        self.cfg = cfg
        self.input_dim = cfg.vit_hidden_dim * cfg.mp_pixel_shuffle_factor ** 2
        self.output_dim = cfg.lm_hidden_dim
        self.scale_factor = cfg.mp_pixel_shuffle_factor
        # nn.Linear weight is (out, in); forward computes x @ W^T.
        # Deterministic init: normal(mean=0, std=0.02), bias-free.
        self.weight = 0.02 * jax.random.normal(
            key, (self.output_dim, self.input_dim), dtype=jnp.float32
        )
        # Pack ONCE: transpose to (in, out), zero-pad K and N to multiples of
        # 128, cast to bf16.  Zero padding contributes zeros to the dot and is
        # sliced off after the kernel, so semantics are unchanged.
        k_pad = _round_up(self.input_dim, 128)
        n_pad = _round_up(self.output_dim, 128)
        self.w_packed = jnp.pad(
            self.weight.T,
            ((0, k_pad - self.input_dim), (0, n_pad - self.output_dim)),
        ).astype(jnp.bfloat16)

    def __call__(self, x):
        return modality_projector_forward(
            x,
            self.w_packed,
            scale_factor=self.scale_factor,
            output_dim=self.output_dim,
        )


# ----------------------------------- main ---------------------------------------
if __name__ == "__main__":
    cfg = Cfg()
    key = jax.random.PRNGKey(0)
    k_w, k_x = jax.random.split(key)

    mp = ModalityProjector(cfg, k_w)

    # Input: (batch=2, seq=256=16x16, embed_dim=32).  After the pixel shuffle:
    # M = 2*64 = 128 tokens, K = 128, N padded 64 -> 128; the M axis is split
    # into two 64-row "parallel" steps so both v7x TCs are active.
    x = jax.random.normal(k_x, (2, 256, cfg.vit_hidden_dim), dtype=jnp.float32)

    out = jax.block_until_ready(mp(x))
    assert out.shape == (2, 64, cfg.lm_hidden_dim), out.shape

    # Reference with the same bf16 operand quantization and f32 accumulation.
    xs = pixel_shuffle(x, cfg.mp_pixel_shuffle_factor)
    xs_b = xs.astype(jnp.bfloat16).astype(jnp.float32)
    w_b = mp.weight.T.astype(jnp.bfloat16).astype(jnp.float32)
    ref = jnp.dot(xs_b, w_b, precision=jax.lax.Precision.HIGHEST)
    max_err = float(jnp.max(jnp.abs(out - ref)))
    assert jnp.allclose(out, ref, atol=1e-4, rtol=1e-4), max_err

    print("KERNEL_OK")
</pallas_src>

<mosaic_0001>
module attributes {stable_mosaic.version = 11 : i64} {
  func.func @_proj_kernel(%arg0: i32, %arg1: i32, %arg2: i32, %arg3: memref<64x128xbf16, #tpu.memory_space<vmem>>, %arg4: memref<128x128xbf16, #tpu.memory_space<vmem>>, %arg5: memref<64x128xf32, #tpu.memory_space<vmem>>, %arg6: memref<64x128xf32, #tpu.memory_space<vmem>>) attributes {dimension_semantics = [#tpu.dimension_semantics<parallel>, #tpu.dimension_semantics<parallel>, #tpu.dimension_semantics<arbitrary>], iteration_bounds = array<i64: 2, 1, 1>, scalar_prefetch = 0 : i64, scratch_operands = 1 : i64, tpu.core_type = #tpu.core_type<tc>, window_params = [{transform_indices = @transform_0, window_bounds = array<i64: 64, 128>}, {transform_indices = @transform_1, window_bounds = array<i64: 128, 128>}, {transform_indices = @transform_2, window_bounds = array<i64: 64, 128>}]} {
    %c0_i32 = arith.constant 0 : i32
    %0 = arith.cmpi eq, %arg2, %c0_i32 : i32
    %1 = arith.extui %0 : i1 to i32
    %c0_i32_0 = arith.constant 0 : i32
    %2 = arith.cmpi ne, %1, %c0_i32_0 : i32
    scf.if %2 {
      %cst_10 = arith.constant 0.000000e+00 : f32
      %12 = vector.broadcast %cst_10 : f32 to vector<64x128xf32>
      %c0_11 = arith.constant 0 : index
      %c0_12 = arith.constant 0 : index
      %13 = vector.load %arg6[%c0_11, %c0_12] : memref<64x128xf32, #tpu.memory_space<vmem>>, vector<64x128xf32>
      tpu.vector_store %arg6[%c0_11, %c0_12], %12 {strides = array<i32>} : memref<64x128xf32, #tpu.memory_space<vmem>>, vector<64x128xf32>,
    } else {
    }
    %c0 = arith.constant 0 : index
    %c0_1 = arith.constant 0 : index
    %3 = vector.load %arg6[%c0, %c0_1] : memref<64x128xf32, #tpu.memory_space<vmem>>, vector<64x128xf32>
    %c0_2 = arith.constant 0 : index
    %c0_3 = arith.constant 0 : index
    %4 = vector.load %arg3[%c0_2, %c0_3] : memref<64x128xbf16, #tpu.memory_space<vmem>>, vector<64x128xbf16>
    %c0_4 = arith.constant 0 : index
    %c0_5 = arith.constant 0 : index
    %5 = vector.load %arg4[%c0_4, %c0_5] : memref<128x128xbf16, #tpu.memory_space<vmem>>, vector<128x128xbf16>
    %cst = arith.constant dense<0.000000e+00> : vector<64x128xf32>
    %6 = tpu.matmul %4, %5, %cst {dimension_numbers = #tpu.dot_dimension_numbers<[1], [0], [0], [1], [0, 0, 1, 1], [], []>} : vector<64x128xbf16>, vector<128x128xbf16>, vector<64x128xf32> -> vector<64x128xf32>
    %7 = arith.addf %3, %6 : vector<64x128xf32>
    %c0_6 = arith.constant 0 : index
    %c0_7 = arith.constant 0 : index
    %8 = vector.load %arg6[%c0_6, %c0_7] : memref<64x128xf32, #tpu.memory_space<vmem>>, vector<64x128xf32>
    tpu.vector_store %arg6[%c0_6, %c0_7], %7 {strides = array<i32>} : memref<64x128xf32, #tpu.memory_space<vmem>>, vector<64x128xf32>,
    %c0_i32_8 = arith.constant 0 : i32
    %9 = arith.cmpi eq, %arg2, %c0_i32_8 : i32
    %10 = arith.extui %9 : i1 to i32
    %c0_i32_9 = arith.constant 0 : i32
    %11 = arith.cmpi ne, %10, %c0_i32_9 : i32
    scf.if %11 {
      %c0_10 = arith.constant 0 : index
      %c0_11 = arith.constant 0 : index
      %12 = vector.load %arg6[%c0_10, %c0_11] : memref<64x128xf32, #tpu.memory_space<vmem>>, vector<64x128xf32>
      %c0_12 = arith.constant 0 : index
      %c0_13 = arith.constant 0 : index
      %13 = vector.load %arg5[%c0_12, %c0_13] : memref<64x128xf32, #tpu.memory_space<vmem>>, vector<64x128xf32>
      tpu.vector_store %arg5[%c0_12, %c0_13], %12 {strides = array<i32>} : memref<64x128xf32, #tpu.memory_space<vmem>>, vector<64x128xf32>,
    } else {
    }
    return
  }
  func.func @transform_0(%arg0: i32, %arg1: i32, %arg2: i32) -> (i32, i32) {
    %c0_i32 = arith.constant 0 : i32
    return %arg0, %arg2 : i32, i32
  }
  func.func @transform_1(%arg0: i32, %arg1: i32, %arg2: i32) -> (i32, i32) {
    %c0_i32 = arith.constant 0 : i32
    return %arg2, %arg1 : i32, i32
  }
  func.func @transform_2(%arg0: i32, %arg1: i32, %arg2: i32) -> (i32, i32) {
    %c0_i32 = arith.constant 0 : i32
    return %arg0, %arg1 : i32, i32
  }
}

</mosaic_0001>

<bundles_post_ra>
// kernel: modality_projector_forward.1
= control target key start
LH: loop header
LB: loop body
LE: loop exit
PB: predicated region body
PF: predicated region fallthrough
CT: control target
= control target key end

     0   :  { %7 = vsyncpa [#allocation4], 0  ;;  %s925_s0 = inlined_call_operand.vmem [shape: bf16[128,128], index: 0, kind: input, shape index: {}]   ;;  %s926_s1 = inlined_call_operand.vmem [shape: bf16[128,128], index: 1, kind: input, shape index: {}]   ;;  %s927_s2 = inlined_call_operand.hbm [shape: f32[128,128], index: 2, kind: output, shape index: {}]  }
   0x1   :  { %9 = vsyncpa [#allocation4 + $0x1], 0  ;;  %s782_s9 = smov 0   ;;  %s784_s10 = smov 0  }
   0x2   :  { %s786_s11 = smov 0   ;;  %s788_s12 = smov 0  }
   0x3   :  { %s790_s13 = smov 0   ;;  %s792_s14 = smov 0  }
   0x4 LB: > { %s538_s15 = sadd.s32 4294967295, %s762_s14   ;;  %s539_s16 = sadd.s32 4294967294, %s762_s14   ;;  %s762_s14 = sphi %s792_s14, %s15_s14   ;;  %s758_s13 = sphi %s790_s13, %s934_s13   ;;  %s754_s12 = sphi %s788_s12, %s933_s12   ;;  %s750_s11 = sphi %s786_s11, %s932_s11   ;;  %s746_s10 = sphi %s784_s10, %s931_s10   ;;  %s742_s9 = sphi %s782_s9, %s930_s9  }
   0x5   : > { %s34_s17 = sadd.s32 1, %s758_s13  ;;  %s99_s18 = sadd.s32 1, %s750_s11 }
   0x6   : > { %p36_p0 = scmp.ge.s32.totalorder %s34_s17, 2  ;;  %p109_p1 = scmp.ne.s32.totalorder %s750_s11, %s746_s10 }
   0x7   : > { %p110_p2 = scmp.eq.s32.totalorder %s538_s15, 1  ;;  %p115_p3 = scmp.ne.s32.totalorder %s746_s10, %s742_s9 }
   0x8   : > { %s936_s17 = smov (%p36_p0, %s34_s17), 0  ;;  %p116_p5 = scmp.eq.s32.totalorder %s539_s16, 1 }
   0x9   : > { %p822_p4 = por %p110_p2, %p109_p1  ;;  %s94_s20 = ssub.s32 %s758_s13, %s936_s17 }
   0xa   : > { %p543_p6 = scmp.ge.s32.totalorder %s762_s14, 1  ;;  %p97_p7 = scmp.eq.s32.totalorder %s94_s20, 0 }
   0xb   : > { %p829_p8 = por %p116_p5, %p115_p3  ;;  %p158_p9 = scmp.lt.s32.totalorder %s762_s14, 3 }
   0xc   : > { %s835_s22 = scalar_select %p97_p7, %s750_s11, %s99_s18  }
   0xd   : > { %p159_p10 = pnand %p543_p6, %p158_p9 }
   0xe   : > { %s545_s25 = sshll.u32 (!%p159_p10), %s754_s12, 3  ;;  %s188_s26 = sand.u32 (!%p159_p10), 1, %s746_s10  }
   0xf   : > { %162 = sbr.rel (%p159_p10) target bundleno = 266 (0x10a), region = 28  ;;  %p192_p11 = scmp.lt.s32.totalorder (!%p159_p10), %s545_s25, 15 }
  0x10   : > { %s544_s27 = sshll.u32 (!%p159_p10), %s188_s26, 6  ;;  %s764_s7 = smov (!%p159_p10), [#allocation3]  }
  0x11   : > { %s190_s28 = scalar_lea.vmem (!%p159_p10), [#allocation3], %s544_s27  ;;  %s690_s8 = sshll.u32 (!%p159_p10), %s764_s7, 4  ;;  %s691_s8 = int_to_ptr.vmem [resolvable:$false] %s690_s8 }
  0x12   : > { %s442_s29 = sshll.u32 (!%p159_p10), %s190_s28, 4  ;;  %s692_s15 = scalar_lea.vmem (!%p159_p10), %s691_s8, 2048  ;;  %s873_s29 = int_to_ptr.vmem [resolvable:$true] %s442_s29 }
  0x13   : > { %s686_s6 = scalar_lea.vmem (!%p159_p10), %s873_s29, 1024  ;;  %p693_p1 = scmp.lt.s32.totalorder (!%p159_p10), %s873_s29, %s691_s8 }
  0x14   : > { %v674_v0 = vld [vmem:[%s926_s1 + $0x38] sm:$0xff]   ;;  %v675_v1 = vld [vmem:[%s926_s1 + $0x30] sm:$0xff]   ;;  %s938_s25 = smov (!%p192_p11, %s545_s25), 15  ;;  %v676_v2 = vld [vmem:[%s926_s1 + $0x28] sm:$0xff]   ;;  %p687_p12 = scmp.ne.s32.totalorder %s873_s29, %s686_s6 }
  0x15   : > { %577 = vmatprep.subr.bf16.mxu0 %v674_v0  ;;  %601 = vmatprep.subr.bf16.mxu1 %v674_v0  ;;  %s546_s30 = sshll.u32 %s938_s25, 2  ;;  %v677_v3 = vld [vmem:[%s926_s1 + $0x20] sm:$0xff]   ;;  %v678_v6 = vld [vmem:[%s926_s1 + $0x18] sm:$0xff]   ;;  %v679_v7 = vld [vmem:[%s926_s1 + $0x10] sm:$0xff]   ;;  %p694_p2 = scmp.lt.s32.totalorder %s692_s15, %s686_s6 }
  0x16   : > { %578 = vmatpush3.bf16.msra.mxu0 %v674_v0  ;;  %609 = vmatpush3.bf16.msra.mxu1 %v674_v0  ;;  %s850_s5 = scalar_lea.vmem %s925_s0, %s546_s30  ;;  %v680_v8 = vld [vmem:[%s926_s1 + $0x8] sm:$0xff]   ;;  %v681_v9 = vld [vmem:[%s926_s1] sm:$0xff]   ;;  %s564_s30 = sshll.u32 %s754_s12, 10 }
  0x17   : > { %579 = vmatprep.subr.bf16.mxu0 %v675_v1  ;;  %602 = vmatprep.subr.bf16.mxu1 %v675_v1  ;;  %v682_v4 = vld [vmem:[%s850_s5] sm:$0xff]   ;;  %v683_v5 = vld [vmem:[%s850_s5 + $0x10] sm:$0xff]   ;;  %v684_v10 = vld [vmem:[%s850_s5 + $0x8] sm:$0xff]   ;;  %s880_s12 = scalar_lea.sflag [#allocation4], %s188_s26  ;;  %p688_p13 = pnand %p687_p12, %p822_p4 }
  0x18   : > { %593 = vmatprep.mubr.bf16.mxu0 %v682_v4  ;;  %597 = vmatprep.mubr.bf16.mxu1 %v683_v5  ;;  %v685_v11 = vld [vmem:[%s850_s5 + $0x18] sm:$0xff]   ;;  %s878_s5 = scalar_lea.hbm %s927_s2, %s564_s30  ;;  %p695_p3 = por %p694_p2, %p693_p1 }
  0x19   : > { %p689_p0 = pneg %p688_p13 }
  0x1a   : > { %580 = vmatpush3.bf16.msra.mxu0 %v675_v1  ;;  %610 = vmatpush3.bf16.msra.mxu1 %v675_v1 }
  0x1b   : > { %581 = vmatprep.subr.bf16.mxu0 %v676_v2  ;;  %603 = vmatprep.subr.bf16.mxu1 %v676_v2  ;;  %p696_p5 = pnand %p695_p3, %p689_p0 }
  0x1e   : > { %582 = vmatpush3.bf16.msra.mxu0 %v676_v2  ;;  %611 = vmatpush3.bf16.msra.mxu1 %v676_v2 }
  0x1f   : > { %583 = vmatprep.subr.bf16.mxu0 %v677_v3  ;;  %604 = vmatprep.subr.bf16.mxu1 %v677_v3 }
  0x22   : > { %584 = vmatpush3.bf16.msra.mxu0 %v677_v3  ;;  %612 = vmatpush3.bf16.msra.mxu1 %v677_v3 }
  0x23   : > { %585 = vmatprep.subr.bf16.mxu0 %v678_v6  ;;  %605 = vmatprep.subr.bf16.mxu1 %v678_v6 }
  0x26   : > { %586 = vmatpush3.bf16.msra.mxu0 %v678_v6  ;;  %613 = vmatpush3.bf16.msra.mxu1 %v678_v6 }
  0x27   : > { %587 = vmatprep.subr.bf16.mxu0 %v679_v7  ;;  %606 = vmatprep.subr.bf16.mxu1 %v679_v7 }
  0x2a   : > { %588 = vmatpush3.bf16.msra.mxu0 %v679_v7  ;;  %614 = vmatpush3.bf16.msra.mxu1 %v679_v7 }
  0x2b   : > { %589 = vmatprep.subr.bf16.mxu0 %v680_v8  ;;  %607 = vmatprep.subr.bf16.mxu1 %v680_v8 }
  0x2e   : > { %590 = vmatpush3.bf16.msra.mxu0 %v680_v8  ;;  %615 = vmatpush3.bf16.msra.mxu1 %v680_v8 }
  0x2f   : > { %591 = vmatprep.subr.bf16.mxu0 %v681_v9  ;;  %608 = vmatprep.subr.bf16.mxu1 %v681_v9 }
  0x32   : > { %592 = vmatpush3.bf16.msra.mxu0 %v681_v9  ;;  %616 = vmatpush3.bf16.msra.mxu1 %v681_v9 }
  0x35   : > { %594 = vmatmul.mubr.bf16.vlgmr.msra.gmra.mxu0 %v684_v10  ;;  %598 = vmatmul.mubr.bf16.vlgmr.msra.gmra.mxu1 %v685_v11 }
  0xf5   : > { %v595_v12 = vpop.f32.mrf.mxu0  ;;  %v599_v13 = vpop.f32.mrf.mxu1 }
  0xf6   : > { %421 = vst [vmem:[%s190_s28 + $0x10] sm:$0xff] %v595_v12  ;;  %425 = vst [vmem:[%s190_s28 + $0x30] sm:$0xff] %v599_v13 }
  0xf7   : > { %v361_v14 = vpop.f32.mrf.mxu0  ;;  %v377_v15 = vpop.f32.mrf.mxu1 }
  0xf8   : > { %419 = vst [vmem:[%s190_s28] sm:$0xff] %v361_v14  ;;  %423 = vst [vmem:[%s190_s28 + $0x20] sm:$0xff] %v377_v15 }
  0xf9   : > { %v596_v16 = vpop.f32.mrf.mxu0  ;;  %v600_v17 = vpop.f32.mrf.mxu1 }
  0xfa   : > { %422 = vst [vmem:[%s190_s28 + $0x18] sm:$0xff] %v596_v16  ;;  %426 = vst [vmem:[%s190_s28 + $0x38] sm:$0xff] %v600_v17 }
  0xfb   : > { %v364_v18 = vpop.f32.mrf.mxu0  ;;  %v380_v19 = vpop.f32.mrf.mxu1 }
  0xfc   : > { %420 = vst [vmem:[%s190_s28 + $0x8] sm:$0xff] %v364_v18  ;;  %424 = vst [vmem:[%s190_s28 + $0x28] sm:$0xff] %v380_v19 }
  0xfd   : > { %699 = shalt.err (!%p696_p5)
}
  0xfe   : > { %s700_s16 = scalar_lea.hbm %s878_s5, 1024  ;;  %s704_s23 = scalar_lea.hbm %s927_s2, 2048 }
  0xff   : > { %p701_p6 = scmp.ne.s32.totalorder %s878_s5, %s700_s16  ;;  %p705_p10 = scmp.lt.s32.totalorder %s878_s5, %s927_s2 }
 0x100   : > { %p706_p11 = scmp.lt.s32.totalorder %s704_s23, %s700_s16 }
 0x101   : > { %p702_p7 = pnand %p701_p6, %p822_p4 }
 0x102   : > { %p707_p12 = por %p706_p11, %p705_p10 }
 0x103   : > { %p703_p9 = pneg %p702_p7 }
 0x105   : > { %p708_p13 = pnand %p707_p12, %p703_p9 }
 0x107   : > { %711 = shalt.err (!%p708_p13)
}
 0x108   : > { %s765_s26 = smov 128   ;;  %s766_s27 = smov 8  }
 0x109   : > { %617 = dma.vmem_to_hbm [thread:$0]  (%p822_p4), %s873_s29, 1024, %s878_s5, %s880_s12, %s765_s26, %s765_s26, %s766_s27  }
 0x10a PF: > { %p623_p0 = scmp.ge.s32.totalorder %s762_s14, 2  ;;  %s457_s28 = sand.u32 1, %s742_s9  }
 0x10b   : > { %s458_s30 = scalar_lea.sflag [#allocation4], %s457_s28 }
 0x10c   : > { %p620_p1 = pnand %p623_p0, %p829_p8 }
 0x10e   : > { %p621_p2 = pneg %p620_p1 }
 0x110   : > { %737 = dma.done.wait (%p621_p2), %s458_s30, 1024  }
 0x111   : > { %739 = vsyncadd (%p621_p2), %s458_s30, 4294966272  ;;  %s15_s14 = sadd.s32 1, %s762_s14   ;;  %s930_s9 = smov %s746_s10 }
 0x112   : > { %p12_p3 = scmp.ge.s32.totalorder %s15_s14, 4   ;;  %s931_s10 = smov %s750_s11 }
 0x113   : > { %s932_s11 = smov %s835_s22  ;;  %s933_s12 = smov %s758_s13 }
 0x114   : > { %s934_s13 = smov %s936_s17  ;;  %14 = sbr.rel (!%p12_p3) target bundleno = 4 (0x4), region = 74 }
 0x119   :  { %463 = vsyncpa [#allocation4], 1 }
 0x11a   :  { %465 = vsyncpa [#allocation4 + $0x1], 1 }

</bundles_post_ra>
